<compile_context>
chip_gen: v7x
topology: tpu7x:2x2x1
jax: 0.10.0
libtpu: 0.0.40
codegen_flags: <defaults>
</compile_context>

<pallas_src>
import jax
import jax.numpy as jnp
import numpy as np
from jax.experimental import pallas as pl
from jax.experimental.pallas import tpu as pltpu

LANES = 128
TARGET_BLOCK_BYTES = 2 * 1024 * 1024    # ~2 MiB per input block (dtype-aware rows)
VMEM_LIMIT_BYTES = 32 * 1024 * 1024     # explicit; within physical VMEM on v5e/v6e/v7x


def _component_meta(n, itemsize, max_block_rows=None):
    """Static tiling metadata for one flattened component of n elements."""
    rows = pl.cdiv(n, LANES)
    if max_block_rows is None:
        max_rows = TARGET_BLOCK_BYTES // (LANES * int(itemsize))
    else:
        max_rows = int(max_block_rows)
    max_rows = max(8, ((max_rows + 7) // 8) * 8)    # multiple of 8 sublanes
    block_rows = max_rows if rows >= max_rows else rows
    nblocks = pl.cdiv(rows, block_rows)
    return rows, block_rows, nblocks


def _prep(x, rows):
    """Flatten to (rows, 128) in native dtype, zero-padding lanes only if needed."""
    x = jnp.asarray(x).reshape(-1)
    n = x.shape[0]
    padded = rows * LANES
    if padded != n:
        # TODO(synk): for a LARGE component whose size is not a multiple of 128
        # this pad is an extra HBM round-trip; the <128-element tail could be
        # folded into the scalar epilogue instead.  Typical module inputs are
        # either tiny or lane-divisible, so keep the simple path here.
        x = jnp.pad(x, (0, padded - n))
    return x.reshape(rows, LANES)


def _make_kernel(meta_p, meta_l, scale_p, scale_l, steps):
    """Build the fused squared-error kernel with all shapes/weights baked in.

    meta_* = (rows, block_rows, nblocks, has_tail, needs_gate)
    """
    rows_p, bm_p, nb_p, tail_p, gate_p = meta_p
    rows_l, bm_l, nb_l, tail_l, gate_l = meta_l

    def _accumulate(block_idx, a_ref, b_ref, acc_ref, rows, bm, nblocks,
                    has_tail, needs_gate):
        def add(mask_rows):
            d = a_ref[...].astype(jnp.float32) - b_ref[...].astype(jnp.float32)
            if mask_rows:
                # Row-only mask: sub-128 lane tails are already zero-padded
                # host-side, so only out-of-range *rows* must be zeroed.
                row = jax.lax.broadcasted_iota(jnp.int32, (bm, LANES), 0)
                d = jnp.where(block_idx * bm + row < rows, d, 0.0)
            sq = d * d
            if bm % 8 == 0:
                # Pure vreg-wise VPU adds into an (8, 128) accumulator.
                acc_ref[...] += jnp.sum(sq.reshape(bm // 8, 8, LANES), axis=0)
            else:
                # Single-block component: (1, 128) accumulator.
                acc_ref[...] += jnp.sum(sq, axis=0, keepdims=True)

        if not has_tail and not needs_gate:
            add(False)                       # steady-state fast path, no mask
        elif has_tail:
            @pl.when(block_idx < nblocks - 1)
            def _():
                add(False)                   # full interior blocks: unmasked

            @pl.when(block_idx == nblocks - 1)
            def _():
                add(True)                    # only the last block can be partial
        else:
            @pl.when(block_idx < nblocks)
            def _():
                add(False)                   # skip once past this component

    def kernel(ap_ref, tp_ref, al_ref, tl_ref, out_ref, accp_ref, accl_ref):
        c = pl.program_id(0)
        j = pl.program_id(1)
        block_idx = c * steps + j

        @pl.when(j == 0)
        def _():
            accp_ref[...] = jnp.zeros_like(accp_ref)
            accl_ref[...] = jnp.zeros_like(accl_ref)

        _accumulate(block_idx, ap_ref, tp_ref, accp_ref, rows_p, bm_p, nb_p,
                    tail_p, gate_p)
        _accumulate(block_idx, al_ref, tl_ref, accl_ref, rows_l, bm_l, nb_l,
                    tail_l, gate_l)

        @pl.when(j == steps - 1)
        def _():
            # One cross-sublane reduce per grid-half; weights/1e-N folded here.
            row = (jnp.float32(scale_p)
                   * jnp.sum(accp_ref[...], axis=0, keepdims=True)
                   + jnp.float32(scale_l)
                   * jnp.sum(accl_ref[...], axis=0, keepdims=True))
            out_ref[...] = row.reshape(1, 1, LANES)

    return kernel


def general_multicomponent_proxy_loss(inputs, targets, weight_cls, weight_lpips,
                                      labels=None, *, max_block_rows=None):
    """Forward pass of GeneralMulticomponentProxyLoss (dict-of-tensors API)."""
    assert isinstance(inputs, dict), f"Wrong type: {type(inputs)}"
    assert isinstance(targets, dict), f"Wrong type: {type(targets)}"
    assert inputs.keys() == targets.keys(), "Keys of inputs and targets don't match"

    pred_preds, target_preds = inputs["predictions"], targets["predictions"]
    pred_lpips, target_lpips = inputs["lpips"], targets["lpips"]
    assert pred_preds.shape == target_preds.shape
    assert pred_lpips.shape == target_lpips.shape

    n_p = int(pred_preds.size)
    n_l = int(pred_lpips.size)
    assert n_p > 0 and n_l > 0, "empty component tensors are not supported"

    itemsize_p = max(jnp.dtype(pred_preds.dtype).itemsize,
                     jnp.dtype(target_preds.dtype).itemsize)
    itemsize_l = max(jnp.dtype(pred_lpips.dtype).itemsize,
                     jnp.dtype(target_lpips.dtype).itemsize)

    rows_p, bm_p, nb_p = _component_meta(n_p, itemsize_p, max_block_rows)
    rows_l, bm_l, nb_l = _component_meta(n_l, itemsize_l, max_block_rows)

    grid_blocks = max(nb_p, nb_l)
    # Multi-block inputs: split the reduction over a leading "parallel" axis so
    # v7x's two TensorCores each stream half the bytes (runs sequentially and
    # harmlessly on single-core v5e/v6e).  Tiny single-block inputs stay fused.
    split = 2 if grid_blocks >= 2 else 1
    steps = pl.cdiv(grid_blocks, split)
    total_blocks = split * steps

    tail_p = (rows_p % bm_p) != 0
    tail_l = (rows_l % bm_l) != 0
    gate_p = nb_p < total_blocks
    gate_l = nb_l < total_blocks

    ap = _prep(pred_preds, rows_p)
    tp = _prep(target_preds, rows_p)
    al = _prep(pred_lpips, rows_l)
    tl = _prep(target_lpips, rows_l)

    scale_p = float(weight_cls) / n_p
    scale_l = float(weight_lpips) / n_l

    def _in_spec(bm, nblocks):
        if nblocks >= total_blocks:
            return pl.BlockSpec((bm, LANES), lambda c, j: (c * steps + j, 0))
        # Fewer blocks than the fused grid: clamp to the last block.  The
        # revisited block is NOT re-processed (its @pl.when gate skips it) and
        # Pallas does not re-fetch an unchanged block index.
        return pl.BlockSpec(
            (bm, LANES),
            lambda c, j: (jnp.minimum(c * steps + j, nblocks - 1), 0))

    acc_shape_p = (8, LANES) if bm_p % 8 == 0 else (1, LANES)
    acc_shape_l = (8, LANES) if bm_l % 8 == 0 else (1, LANES)

    kernel = _make_kernel((rows_p, bm_p, nb_p, tail_p, gate_p),
                          (rows_l, bm_l, nb_l, tail_l, gate_l),
                          scale_p, scale_l, steps)

    cost = pl.CostEstimate(
        flops=3 * (n_p + n_l),
        transcendentals=0,
        bytes_accessed=int(ap.size * ap.dtype.itemsize
                           + tp.size * tp.dtype.itemsize
                           + al.size * al.dtype.itemsize
                           + tl.size * tl.dtype.itemsize
                           + split * LANES * 4))

    out = pl.pallas_call(
        kernel,
        out_shape=jax.ShapeDtypeStruct((split, 1, LANES), jnp.float32),
        grid_spec=pltpu.PrefetchScalarGridSpec(
            num_scalar_prefetch=0,
            grid=(split, steps),
            in_specs=[
                _in_spec(bm_p, nb_p),
                _in_spec(bm_p, nb_p),
                _in_spec(bm_l, nb_l),
                _in_spec(bm_l, nb_l),
            ],
            out_specs=pl.BlockSpec((1, 1, LANES), lambda c, j: (c, 0, 0)),
            scratch_shapes=[
                pltpu.VMEM(acc_shape_p, jnp.float32),
                pltpu.VMEM(acc_shape_l, jnp.float32),
            ],
        ),
        compiler_params=pltpu.CompilerParams(
            dimension_semantics=("parallel", "arbitrary"),
            vmem_limit_bytes=VMEM_LIMIT_BYTES),
        cost_estimate=cost,
    )(ap, tp, al, tl)

    # Tiny epilogue: sum the (split, 1, 128) pre-scaled partial rows.
    return jnp.sum(out)


if __name__ == "__main__":
    key = jax.random.PRNGKey(0)
    k1, k2, k3, k4, k5, k6, k7, k8 = jax.random.split(key, 8)

    weight_cls, weight_lpips = 0.7, 0.3

    def ref_loss(pp, tp, pls, tls):
        return (weight_cls * jnp.mean((pp.astype(jnp.float32)
                                       - tp.astype(jnp.float32)) ** 2)
                + weight_lpips * jnp.mean((pls.astype(jnp.float32)
                                           - tls.astype(jnp.float32)) ** 2))

    # --- Test 1: module-typical tiny shapes (single block per component) ---
    pred_preds = jax.random.normal(k1, (2, 10), dtype=jnp.float32)
    target_preds = jax.random.normal(k2, (2, 10), dtype=jnp.float32)
    pred_lpips = jax.random.uniform(k3, (2, 1, 1, 1), dtype=jnp.float32)
    target_lpips = jax.random.uniform(k4, (2, 1, 1, 1), dtype=jnp.float32)

    loss = general_multicomponent_proxy_loss(
        {"predictions": pred_preds, "lpips": pred_lpips},
        {"predictions": target_preds, "lpips": target_lpips},
        weight_cls, weight_lpips)
    loss = jax.block_until_ready(loss)
    np.testing.assert_allclose(
        np.asarray(loss),
        np.asarray(ref_loss(pred_preds, target_preds, pred_lpips, target_lpips)),
        rtol=1e-5, atol=1e-6)

    # --- Test 2: bf16 predictions, single large lane-aligned block ---
    pred2 = jax.random.normal(k5, (4, 40000), dtype=jnp.bfloat16)
    targ2 = jax.random.normal(k6, (4, 40000), dtype=jnp.bfloat16)
    loss2 = general_multicomponent_proxy_loss(
        {"predictions": pred2, "lpips": pred_lpips},
        {"predictions": targ2, "lpips": target_lpips},
        weight_cls, weight_lpips)
    loss2 = jax.block_until_ready(loss2)
    np.testing.assert_allclose(
        np.asarray(loss2),
        np.asarray(ref_loss(pred2, targ2, pred_lpips, target_lpips)),
        rtol=1e-5, atol=1e-6)

    # --- Test 3: small max_block_rows to exercise multi-block streaming,
    #     the parallel split, partial-last-block masking and small-component
    #     gating, without needing huge tensors ---
    pred3 = jax.random.normal(k7, (3, 2000), dtype=jnp.float32)
    targ3 = jax.random.normal(k8, (3, 2000), dtype=jnp.float32)
    loss3 = general_multicomponent_proxy_loss(
        {"predictions": pred3, "lpips": pred_lpips},
        {"predictions": targ3, "lpips": target_lpips},
        weight_cls, weight_lpips, max_block_rows=8)
    loss3 = jax.block_until_ready(loss3)
    np.testing.assert_allclose(
        np.asarray(loss3),
        np.asarray(ref_loss(pred3, targ3, pred_lpips, target_lpips)),
        rtol=1e-5, atol=1e-6)

    print("KERNEL_OK")
</pallas_src>

<mosaic_0001>
module attributes {stable_mosaic.version = 11 : i64} {
  func.func @kernel(%arg0: i32, %arg1: i32, %arg2: memref<1x128xf32, #tpu.memory_space<vmem>>, %arg3: memref<1x128xf32, #tpu.memory_space<vmem>>, %arg4: memref<1x128xf32, #tpu.memory_space<vmem>>, %arg5: memref<1x128xf32, #tpu.memory_space<vmem>>, %arg6: memref<1x1x128xf32, #tpu.memory_space<vmem>>, %arg7: memref<1x128xf32, #tpu.memory_space<vmem>>, %arg8: memref<1x128xf32, #tpu.memory_space<vmem>>) attributes {dimension_semantics = [#tpu.dimension_semantics<parallel>, #tpu.dimension_semantics<arbitrary>], iteration_bounds = array<i64: 1, 1>, scalar_prefetch = 0 : i64, scratch_operands = 2 : i64, tpu.core_type = #tpu.core_type<tc>, window_params = [{transform_indices = @transform_0, window_bounds = array<i64: 1, 128>}, {transform_indices = @transform_1, window_bounds = array<i64: 1, 128>}, {transform_indices = @transform_2, window_bounds = array<i64: 1, 128>}, {transform_indices = @transform_3, window_bounds = array<i64: 1, 128>}, {transform_indices = @transform_4, window_bounds = array<i64: 1, 1, 128>}]} {
    %c0_i32 = arith.constant 0 : i32
    %0 = arith.cmpi eq, %arg1, %c0_i32 : i32
    %1 = arith.extui %0 : i1 to i32
    %c0_i32_0 = arith.constant 0 : i32
    %2 = arith.cmpi ne, %1, %c0_i32_0 : i32
    scf.if %2 {
      %cst_19 = arith.constant 0.000000e+00 : f32
      %24 = vector.broadcast %cst_19 : f32 to vector<1x128xf32>
      %c0_20 = arith.constant 0 : index
      %c0_21 = arith.constant 0 : index
      %25 = vector.load %arg7[%c0_20, %c0_21] : memref<1x128xf32, #tpu.memory_space<vmem>>, vector<1x128xf32>
      tpu.vector_store %arg7[%c0_20, %c0_21], %24 {strides = array<i32>} : memref<1x128xf32, #tpu.memory_space<vmem>>, vector<1x128xf32>,
      %cst_22 = arith.constant 0.000000e+00 : f32
      %26 = vector.broadcast %cst_22 : f32 to vector<1x128xf32>
      %c0_23 = arith.constant 0 : index
      %c0_24 = arith.constant 0 : index
      %27 = vector.load %arg8[%c0_23, %c0_24] : memref<1x128xf32, #tpu.memory_space<vmem>>, vector<1x128xf32>
      tpu.vector_store %arg8[%c0_23, %c0_24], %26 {strides = array<i32>} : memref<1x128xf32, #tpu.memory_space<vmem>>, vector<1x128xf32>,
    } else {
    }
    %c0 = arith.constant 0 : index
    %c0_1 = arith.constant 0 : index
    %3 = vector.load %arg2[%c0, %c0_1] : memref<1x128xf32, #tpu.memory_space<vmem>>, vector<1x128xf32>
    %c0_2 = arith.constant 0 : index
    %c0_3 = arith.constant 0 : index
    %4 = vector.load %arg3[%c0_2, %c0_3] : memref<1x128xf32, #tpu.memory_space<vmem>>, vector<1x128xf32>
    %5 = arith.subf %3, %4 : vector<1x128xf32>
    %6 = arith.mulf %5, %5 : vector<1x128xf32>
    %c0_4 = arith.constant 0 : index
    %c0_5 = arith.constant 0 : index
    %7 = vector.load %arg7[%c0_4, %c0_5] : memref<1x128xf32, #tpu.memory_space<vmem>>, vector<1x128xf32>
    %cst = arith.constant dense<0.000000e+00> : vector<128xf32>
    %8 = vector.multi_reduction <add>, %6, %cst [0] : vector<1x128xf32> to vector<128xf32>
    %9 = vector.shape_cast %8 : vector<128xf32> to vector<1x128xf32>
    %10 = arith.addf %7, %9 : vector<1x128xf32>
    %c0_6 = arith.constant 0 : index
    %c0_7 = arith.constant 0 : index
    %11 = vector.load %arg7[%c0_6, %c0_7] : memref<1x128xf32, #tpu.memory_space<vmem>>, vector<1x128xf32>
    tpu.vector_store %arg7[%c0_6, %c0_7], %10 {strides = array<i32>} : memref<1x128xf32, #tpu.memory_space<vmem>>, vector<1x128xf32>,
    %c0_8 = arith.constant 0 : index
    %c0_9 = arith.constant 0 : index
    %12 = vector.load %arg4[%c0_8, %c0_9] : memref<1x128xf32, #tpu.memory_space<vmem>>, vector<1x128xf32>
    %c0_10 = arith.constant 0 : index
    %c0_11 = arith.constant 0 : index
    %13 = vector.load %arg5[%c0_10, %c0_11] : memref<1x128xf32, #tpu.memory_space<vmem>>, vector<1x128xf32>
    %14 = arith.subf %12, %13 : vector<1x128xf32>
    %15 = arith.mulf %14, %14 : vector<1x128xf32>
    %c0_12 = arith.constant 0 : index
    %c0_13 = arith.constant 0 : index
    %16 = vector.load %arg8[%c0_12, %c0_13] : memref<1x128xf32, #tpu.memory_space<vmem>>, vector<1x128xf32>
    %cst_14 = arith.constant dense<0.000000e+00> : vector<128xf32>
    %17 = vector.multi_reduction <add>, %15, %cst_14 [0] : vector<1x128xf32> to vector<128xf32>
    %18 = vector.shape_cast %17 : vector<128xf32> to vector<1x128xf32>
    %19 = arith.addf %16, %18 : vector<1x128xf32>
    %c0_15 = arith.constant 0 : index
    %c0_16 = arith.constant 0 : index
    %20 = vector.load %arg8[%c0_15, %c0_16] : memref<1x128xf32, #tpu.memory_space<vmem>>, vector<1x128xf32>
    tpu.vector_store %arg8[%c0_15, %c0_16], %19 {strides = array<i32>} : memref<1x128xf32, #tpu.memory_space<vmem>>, vector<1x128xf32>,
    %c0_i32_17 = arith.constant 0 : i32
    %21 = arith.cmpi eq, %arg1, %c0_i32_17 : i32
    %22 = arith.extui %21 : i1 to i32
    %c0_i32_18 = arith.constant 0 : i32
    %23 = arith.cmpi ne, %22, %c0_i32_18 : i32
    scf.if %23 {
      %c0_19 = arith.constant 0 : index
      %c0_20 = arith.constant 0 : index
      %24 = vector.load %arg7[%c0_19, %c0_20] : memref<1x128xf32, #tpu.memory_space<vmem>>, vector<1x128xf32>
      %cst_21 = arith.constant dense<0.000000e+00> : vector<128xf32>
      %25 = vector.multi_reduction <add>, %24, %cst_21 [0] : vector<1x128xf32> to vector<128xf32>
      %26 = vector.shape_cast %25 : vector<128xf32> to vector<1x128xf32>
      %cst_22 = arith.constant 3.500000e-02 : f32
      %27 = vector.broadcast %cst_22 : f32 to vector<1x128xf32>
      %28 = arith.mulf %27, %26 : vector<1x128xf32>
      %c0_23 = arith.constant 0 : index
      %c0_24 = arith.constant 0 : index
      %29 = vector.load %arg8[%c0_23, %c0_24] : memref<1x128xf32, #tpu.memory_space<vmem>>, vector<1x128xf32>
      %cst_25 = arith.constant dense<0.000000e+00> : vector<128xf32>
      %30 = vector.multi_reduction <add>, %29, %cst_25 [0] : vector<1x128xf32> to vector<128xf32>
      %31 = vector.shape_cast %30 : vector<128xf32> to vector<1x128xf32>
      %cst_26 = arith.constant 1.500000e-01 : f32
      %32 = vector.broadcast %cst_26 : f32 to vector<1x128xf32>
      %33 = arith.mulf %32, %31 : vector<1x128xf32>
      %34 = arith.addf %28, %33 : vector<1x128xf32>
      %35 = vector.shape_cast %34 : vector<1x128xf32> to vector<1x1x128xf32>
      %c0_27 = arith.constant 0 : index
      %c0_28 = arith.constant 0 : index
      %c0_29 = arith.constant 0 : index
      %36 = vector.load %arg6[%c0_27, %c0_28, %c0_29] : memref<1x1x128xf32, #tpu.memory_space<vmem>>, vector<1x1x128xf32>
      tpu.vector_store %arg6[%c0_27, %c0_28, %c0_29], %35 {strides = array<i32>} : memref<1x1x128xf32, #tpu.memory_space<vmem>>, vector<1x1x128xf32>,
    } else {
    }
    return
  }
  func.func @transform_0(%arg0: i32, %arg1: i32) -> (i32, i32) {
    %c1_i32 = arith.constant 1 : i32
    %0 = arith.muli %arg0, %c1_i32 : i32
    %1 = arith.addi %0, %arg1 : i32
    %c0_i32 = arith.constant 0 : i32
    %c0_i32_0 = arith.constant 0 : i32
    return %1, %c0_i32 : i32, i32
  }
  func.func @transform_1(%arg0: i32, %arg1: i32) -> (i32, i32) {
    %c1_i32 = arith.constant 1 : i32
    %0 = arith.muli %arg0, %c1_i32 : i32
    %1 = arith.addi %0, %arg1 : i32
    %c0_i32 = arith.constant 0 : i32
    %c0_i32_0 = arith.constant 0 : i32
    return %1, %c0_i32 : i32, i32
  }
  func.func @transform_2(%arg0: i32, %arg1: i32) -> (i32, i32) {
    %c1_i32 = arith.constant 1 : i32
    %0 = arith.muli %arg0, %c1_i32 : i32
    %1 = arith.addi %0, %arg1 : i32
    %c0_i32 = arith.constant 0 : i32
    %c0_i32_0 = arith.constant 0 : i32
    return %1, %c0_i32 : i32, i32
  }
  func.func @transform_3(%arg0: i32, %arg1: i32) -> (i32, i32) {
    %c1_i32 = arith.constant 1 : i32
    %0 = arith.muli %arg0, %c1_i32 : i32
    %1 = arith.addi %0, %arg1 : i32
    %c0_i32 = arith.constant 0 : i32
    %c0_i32_0 = arith.constant 0 : i32
    return %1, %c0_i32 : i32, i32
  }
  func.func @transform_4(%arg0: i32, %arg1: i32) -> (i32, i32, i32) {
    %c0_i32 = arith.constant 0 : i32
    %c0_i32_0 = arith.constant 0 : i32
    %c0_i32_1 = arith.constant 0 : i32
    return %arg0, %c0_i32, %c0_i32_0 : i32, i32, i32
  }
}

</mosaic_0001>

<bundles_post_ra>
// kernel: tpu_custom_call.1
= control target key start
LH: loop header
LB: loop body
LE: loop exit
PB: predicated region body
PF: predicated region fallthrough
CT: control target
= control target key end

     0   :  { %9 = vsyncpa [#allocation5], 0  ;;  %s245_s0 = inlined_call_operand.hbm [shape: f32[1,128], index: 0, kind: input, shape index: {}]   ;;  %s246_s1 = inlined_call_operand.vmem [shape: f32[1,128], index: 1, kind: input, shape index: {}]   ;;  %s247_s2 = inlined_call_operand.vmem [shape: f32[1,128], index: 2, kind: input, shape index: {}]   ;;  %s248_s3 = inlined_call_operand.vmem [shape: f32[1,128], index: 3, kind: input, shape index: {}]   ;;  %s249_s4 = inlined_call_operand.hbm [shape: f32[1,1,128], index: 4, kind: output, shape index: {}]  }
   0x1   :  { %10 = vsyncpa [#allocation6], 0  ;;  %s184_s15 = smov [#allocation4]   ;;  %s136_s19 = scalar_lea.hbm %s245_s0, 16 }
   0x2   :  { %s20_s16 = sshll.u32 %s184_s15, 4  ;;  %p137_p0 = scmp.ne.s32.totalorder %s245_s0, %s136_s19  ;;  %s21_s16 = int_to_ptr.vmem [resolvable:$true] %s20_s16 }
   0x3   :  { %p140_p1 = scmp.lt.u32.totalorder %s136_s19, %s245_s0 }
   0x5   :  { %p142_p2 = pnand %p140_p1, %p137_p0 }
   0x7   :  { %145 = shalt.err (!%p142_p2)
}
   0x8   :  { %s146_s24 = scalar_lea.vmem %s21_s16, 16  ;;  %s150_s25 = scalar_lea.vmem %s21_s16, 32 }
   0x9   :  { %p147_p3 = scmp.ne.s32.totalorder %s21_s16, %s146_s24  ;;  %p151_p4 = scmp.lt.s32.totalorder %s21_s16, %s21_s16 }
   0xa   :  { %p152_p5 = scmp.lt.s32.totalorder %s150_s25, %s146_s24 }
   0xc   :  { %p153_p6 = por %p152_p5, %p151_p4 }
   0xe   :  { %p154_p7 = pnand %p153_p6, %p147_p3 }
  0x10   :  { %157 = shalt.err (!%p154_p7)
}
  0x11   :  { %23 = dma.hbm_to_vmem [thread:$0]  %s245_s0, 16, %s21_s16, [#allocation5]  }
  0x12   :  { %180 = dma.done.wait [#allocation5], 16  }
  0x13   :  { %181 = vsyncadd [#allocation5], 4294967280  ;;  %v185_v0 = vmov 0.0   ;;  %v82_v1 = vld [vmem:[#allocation4] sm:$0x1]  ;;  %s186_s0 = smov [#allocation7]  }
  0x14   :  { %80 = vst [vmem:[#allocation2] sm:$0x1] %v185_v0  ;;  %81 = vst [vmem:[#allocation3] sm:$0x1] %v185_v0  ;;  %v83_v2 = vld [vmem:[%s246_s1] sm:$0x1] }
  0x15   :  { %v90_v3 = vld [vmem:[%s247_s2] sm:$0x1]  ;;  %v84_v4 = vsub.f32 %v82_v1, %v83_v2  ;;  %s115_s1 = sshll.u32 %s186_s0, 4  ;;  %s116_s1 = int_to_ptr.vmem [resolvable:$true] %s115_s1 }
  0x16   :  { %v91_v5 = vld [vmem:[%s248_s3] sm:$0x1]  ;;  %s158_s2 = scalar_lea.vmem %s116_s1, 16  ;;  %s162_s3 = scalar_lea.vmem %s116_s1, 32 }
  0x17   :  { %v92_v7 = vsub.f32 %v90_v3, %v91_v5  ;;  %v85_v8 = vmul.f32 %v84_v4, %v84_v4  ;;  %p159_p8 = scmp.ne.s32.totalorder %s116_s1, %s158_s2  ;;  %p163_p9 = scmp.lt.s32.totalorder %s116_s1, %s116_s1 }
  0x18   :  { %p164_p10 = scmp.lt.s32.totalorder %s162_s3, %s158_s2 }
  0x19   :  { %v93_v10 = vmul.f32 %v92_v7, %v92_v7 }
  0x1a   :  { %p165_p11 = por %p164_p10, %p163_p9 }
  0x1b   :  { %v86_v6 = vld [vmem:[#allocation2] sm:$0x1]  ;;  %v94_v9 = vld [vmem:[#allocation3] sm:$0x1] }
  0x1c   :  { %v88_v11 = vadd.f32 %v86_v6, %v85_v8  ;;  %v96_v12 = vadd.f32 %v94_v9, %v93_v10  ;;  %p166_p12 = pnand %p165_p11, %p159_p8 }
  0x1e   :  { %89 = vst [vmem:[#allocation2] sm:$0x1] %v88_v11  ;;  %97 = vst [vmem:[#allocation3] sm:$0x1] %v96_v12 }
  0x25   :  { %v101_v13 = vld [vmem:[#allocation2] sm:$0x1]  ;;  %v104_v15 = vld [vmem:[#allocation3] sm:$0x1] }
  0x26   :  { %v103_v14 = vmul.f32 0.035, %v101_v13  ;;  %v106_v16 = vmul.f32 0.15, %v104_v15 }
  0x28   :  { %v107_v17 = vadd.f32 %v106_v16, %v103_v14 }
  0x2a   :  { %108 = vst [vmem:[#allocation7] sm:$0x1] %v107_v17 }
  0x2b   :  { %169 = shalt.err (!%p166_p12)
}
  0x2c   :  { %s170_s10 = scalar_lea.hbm %s249_s4, 16 }
  0x2d   :  { %p171_p13 = scmp.ne.s32.totalorder %s249_s4, %s170_s10  ;;  %p174_p0 = scmp.lt.u32.totalorder %s170_s10, %s249_s4 }
  0x2f   :  { %p176_p1 = pnand %p174_p0, %p171_p13 }
  0x31   :  { %179 = shalt.err (!%p176_p1)
}
  0x32   :  { %118 = dma.vmem_to_hbm [thread:$0]  %s116_s1, 16, %s249_s4, [#allocation6]  }
  0x33   :  { %182 = dma.done.wait [#allocation6], 16  }
  0x34   :  { %183 = vsyncadd [#allocation6], 4294967280 }
  0x35   :  { %122 = vsyncpa [#allocation5], 1 }
  0x36   :  { %123 = vsyncpa [#allocation6], 1 }

</bundles_post_ra>
